<compile_context>
chip_gen: v7x
topology: tpu7x:2x2x1
jax: 0.10.0
libtpu: 0.0.40
codegen_flags: <defaults>
</compile_context>

<pallas_src>
import functools

import jax
import jax.numpy as jnp
from jax.experimental import pallas as pl
from jax.experimental.pallas import tpu as pltpu


# -----------------------------------------------------------------------------
# Kernel: one (batch element, layer) step.  Grid = (B, L), L innermost.
# -----------------------------------------------------------------------------
def transformer_kernel(
    x_ref,       # (1, N, C)
    vec_ref,     # (1, 6, C)   rows: [ln1_w, ln1_b, bproj, ln2_w, ln2_b, b2]
    wqkv_ref,    # (1, 3, H, C, hd)  head-major, (in, out); Wq pre-scaled
    wp_ref,      # (1, H, hd, C)     per-head slice of the output projection
    w1_ref,      # (1, C, Hmlp)      (in, out)
    b1_ref,      # (1, 1, Hmlp)
    w2_ref,      # (1, Hmlp, C)      (in, out)
    o_ref,       # (1, N, C)
    acc_ref,     # VMEM scratch (N, C) f32 — activation carried across layers
    *,
    num_heads: int,
    eps: float,
):
    layer = pl.program_id(1)

    # Load the input activation only on the first layer of this batch element.
    @pl.when(layer == 0)
    def _():
        acc_ref[...] = x_ref[0].astype(jnp.float32)

    x = acc_ref[...]                          # (N, C) f32
    N, C = x.shape

    def layernorm(v, w, b):
        mu = jnp.mean(v, axis=-1, keepdims=True)
        var = jnp.mean((v - mu) ** 2, axis=-1, keepdims=True)
        return (v - mu) * jax.lax.rsqrt(var + eps) * w + b

    # ---- attention branch ---------------------------------------------------
    ln1 = layernorm(x, vec_ref[0, 0], vec_ref[0, 1])                 # (N, C)
    ln1_h = jnp.broadcast_to(ln1[None], (num_heads, N, C))           # (H, N, C)

    # Head-major projections: one batched matmul each, no transposes/slices.
    # (Softmax scale already folded into Wq at packing time.)
    q = jnp.einsum('hnc,hcd->hnd', ln1_h, wqkv_ref[0, 0],
                   preferred_element_type=jnp.float32)               # (H, N, hd)
    k = jnp.einsum('hnc,hcd->hnd', ln1_h, wqkv_ref[0, 1],
                   preferred_element_type=jnp.float32)               # (H, N, hd)
    v = jnp.einsum('hnc,hcd->hnd', ln1_h, wqkv_ref[0, 2],
                   preferred_element_type=jnp.float32)               # (H, N, hd)

    s = jnp.einsum('hnd,hmd->hnm', q, k,
                   preferred_element_type=jnp.float32)               # (H, N, N)
    s = s - jnp.max(s, axis=-1, keepdims=True)
    p = jnp.exp(s)
    p = p * pl.reciprocal(jnp.sum(p, axis=-1, keepdims=True), approx=True)

    ctx = jnp.einsum('hnm,hmd->hnd', p, v,
                     preferred_element_type=jnp.float32)              # (H, N, hd)

    # Fused head-merge + output projection: sum_h (ctx_h @ Wp_h) + b.
    proj = jnp.einsum('hnd,hdc->hnc', ctx, wp_ref[0],
                      preferred_element_type=jnp.float32)             # (H, N, C)
    attn = jnp.sum(proj, axis=0) + vec_ref[0, 2]                      # (N, C)
    x = x + attn

    # ---- mlp branch ----------------------------------------------------------
    ln2 = layernorm(x, vec_ref[0, 3], vec_ref[0, 4])
    h = jnp.dot(ln2, w1_ref[0], preferred_element_type=jnp.float32) + b1_ref[0, 0]
    h = jnp.maximum(h, 0.0)                                            # relu
    mlp = jnp.dot(h, w2_ref[0], preferred_element_type=jnp.float32) + vec_ref[0, 5]
    x = x + mlp

    acc_ref[...] = x

    # Emit the result only after the last layer.
    @pl.when(layer == pl.num_programs(1) - 1)
    def _():
        o_ref[0] = x.astype(o_ref.dtype)


# -----------------------------------------------------------------------------
# Wrapper: single pallas_call over grid (B, num_layers).
# -----------------------------------------------------------------------------
def transformer_forward(x, packed, *, num_heads, eps=1e-5):
    B, N, C = x.shape
    L = packed["wqkv"].shape[0]
    hd = C // num_heads
    Hm = packed["w1"].shape[-1]

    def layer_spec(*tail):
        zeros = (0,) * len(tail)

        def idx(b, l):
            return (l,) + zeros

        return pl.BlockSpec((1,) + tuple(tail), idx)

    in_specs = [
        pl.BlockSpec((1, N, C), lambda b, l: (b, 0, 0)),   # x
        layer_spec(6, C),                                  # packed C-width vecs
        layer_spec(3, num_heads, C, hd),                   # Wqkv (head-major)
        layer_spec(num_heads, hd, C),                      # Wproj (per head)
        layer_spec(C, Hm),                                 # fc1 w
        layer_spec(1, Hm),                                 # fc1 b
        layer_spec(Hm, C),                                 # fc2 w
    ]
    out_spec = pl.BlockSpec((1, N, C), lambda b, l: (b, 0, 0))

    kernel = functools.partial(transformer_kernel, num_heads=num_heads, eps=eps)
    return pl.pallas_call(
        kernel,
        out_shape=jax.ShapeDtypeStruct((B, N, C), x.dtype),
        grid_spec=pltpu.PrefetchScalarGridSpec(
            num_scalar_prefetch=0,
            grid=(B, L),
            in_specs=in_specs,
            out_specs=out_spec,
            scratch_shapes=[pltpu.VMEM((N, C), jnp.float32)],
        ),
        compiler_params=pltpu.CompilerParams(
            dimension_semantics=("parallel", "arbitrary")),
    )(
        x,
        packed["vec"],
        packed["wqkv"],
        packed["wp"],
        packed["w1"], packed["b1"],
        packed["w2"],
    )


# -----------------------------------------------------------------------------
# Parameter repacking: PyTorch (out, in) layouts -> kernel-friendly layouts.
# Done once, outside the kernel.
# -----------------------------------------------------------------------------
def pack_params(layer_params, num_heads):
    C = layer_params[0]["wq"].shape[0]
    Hm = layer_params[0]["w1"].shape[0]
    hd = C // num_heads
    scale = float(hd) ** -0.5

    def stack(fn):
        return jnp.stack([fn(p) for p in layer_params], axis=0)

    def split_heads(w_t):  # (C_in, C_out) -> (num_heads, C_in, hd)
        return w_t.reshape(C, num_heads, hd).transpose(1, 0, 2)

    def qkv(p):
        wq = split_heads(p["wq"].T) * scale       # fold softmax scale into Wq
        wk = split_heads(p["wkv"].T[:, :C])
        wv = split_heads(p["wkv"].T[:, C:])
        return jnp.stack([wq, wk, wv], axis=0)    # (3, H, C, hd)

    def vecs(p):  # (6, C): ln1_w, ln1_b, bproj, ln2_w, ln2_b, b2
        return jnp.stack([p["ln1_w"], p["ln1_b"], p["bp"],
                          p["ln2_w"], p["ln2_b"], p["b2"]], axis=0)

    return {
        "vec": stack(vecs),                                   # (L, 6, C)
        "wqkv": stack(qkv),                                   # (L, 3, H, C, hd)
        "wp": stack(lambda p: p["wp"].T.reshape(num_heads, hd, C)),
        "w1": stack(lambda p: p["w1"].T),                     # (L, C, Hm)
        "b1": stack(lambda p: p["b1"].reshape(1, Hm)),        # (L, 1, Hm)
        "w2": stack(lambda p: p["w2"].T),                     # (L, Hm, C)
    }


# -----------------------------------------------------------------------------
# Pure-JAX reference mirroring the PyTorch forward exactly (for validation).
# -----------------------------------------------------------------------------
def ref_layer(x, p, num_heads, eps=1e-5):
    B, N, C = x.shape
    hd = C // num_heads
    scale = hd ** -0.5

    def ln(v, w, b):
        mu = jnp.mean(v, axis=-1, keepdims=True)
        var = jnp.mean((v - mu) ** 2, axis=-1, keepdims=True)
        return (v - mu) / jnp.sqrt(var + eps) * w + b

    h1 = ln(x, p["ln1_w"], p["ln1_b"])
    q = (h1 @ p["wq"].T).reshape(B, N, num_heads, hd)
    kv = (h1 @ p["wkv"].T).reshape(B, N, 2, num_heads, hd)
    k, v = kv[:, :, 0], kv[:, :, 1]
    att = jnp.einsum("bnhd,bmhd->bnmh", q, k) * scale
    att = jax.nn.softmax(att, axis=2)
    out = jnp.einsum("bnmh,bmhd->bnhd", att, v).reshape(B, N, C)
    out = out @ p["wp"].T + p["bp"]
    x = x + out
    h2 = ln(x, p["ln2_w"], p["ln2_b"])
    m = jnp.maximum(h2 @ p["w1"].T + p["b1"], 0.0) @ p["w2"].T + p["b2"]
    return x + m


# -----------------------------------------------------------------------------
# Deterministic parameter init (PyTorch layouts).
# -----------------------------------------------------------------------------
def init_layer_params(key, C, Hm):
    ks = jax.random.split(key, 8)
    s = 0.05
    return {
        "ln1_w": jnp.ones((C,), jnp.float32),
        "ln1_b": jnp.zeros((C,), jnp.float32),
        "wq":  s * jax.random.normal(ks[0], (C, C), jnp.float32),
        "wkv": s * jax.random.normal(ks[1], (2 * C, C), jnp.float32),
        "wp":  s * jax.random.normal(ks[2], (C, C), jnp.float32),
        "bp":  s * jax.random.normal(ks[3], (C,), jnp.float32),
        "ln2_w": jnp.ones((C,), jnp.float32),
        "ln2_b": jnp.zeros((C,), jnp.float32),
        "w1":  s * jax.random.normal(ks[4], (Hm, C), jnp.float32),
        "b1":  s * jax.random.normal(ks[5], (Hm,), jnp.float32),
        "w2":  s * jax.random.normal(ks[6], (C, Hm), jnp.float32),
        "b2":  s * jax.random.normal(ks[7], (C,), jnp.float32),
    }


if __name__ == "__main__":
    # Transformer(dim_self=32, num_heads=4, num_layers=2, mlp_ratio=2.0)
    B, N, C = 2, 8, 32
    num_heads = 4
    num_layers = 2
    Hm = int(C * 2.0)

    key = jax.random.PRNGKey(0)
    kx, *kls = jax.random.split(key, 1 + num_layers)
    x = jax.random.normal(kx, (B, N, C), jnp.float32)
    layer_params = [init_layer_params(kls[i], C, Hm) for i in range(num_layers)]
    packed = pack_params(layer_params, num_heads)

    out = transformer_forward(x, packed, num_heads=num_heads)
    out = jax.block_until_ready(out)

    ref = x
    for p in layer_params:
        ref = ref_layer(ref, p, num_heads)

    assert out.shape == (B, N, C)
    max_diff = jnp.max(jnp.abs(out - ref))
    # Tolerance loosened slightly vs f32-exact because of the EUP approximate
    # reciprocal used for the softmax denominator (and the Wq-folded scale).
    assert jnp.allclose(out, ref, rtol=2e-3, atol=2e-3), (
        f"max abs diff {max_diff}")

    # TODO(synk): `mask` / enc_dec cross-attention paths are unused by the
    # default forward (y=None, mask=None, enc_dec=False) and are not kernelized.
    print("KERNEL_OK")
</pallas_src>

<mosaic_0001>
module attributes {stable_mosaic.version = 11 : i64} {
  func.func @transformer_kernel(%arg0: i32, %arg1: i32, %arg2: memref<1x8x32xf32, #tpu.memory_space<vmem>>, %arg3: memref<1x6x32xf32, #tpu.memory_space<vmem>>, %arg4: memref<1x3x4x32x8xf32, #tpu.memory_space<vmem>>, %arg5: memref<1x4x8x32xf32, #tpu.memory_space<vmem>>, %arg6: memref<1x32x64xf32, #tpu.memory_space<vmem>>, %arg7: memref<1x1x64xf32, #tpu.memory_space<vmem>>, %arg8: memref<1x64x32xf32, #tpu.memory_space<vmem>>, %arg9: memref<1x8x32xf32, #tpu.memory_space<vmem>>, %arg10: memref<8x32xf32, #tpu.memory_space<vmem>>) attributes {dimension_semantics = [#tpu.dimension_semantics<parallel>, #tpu.dimension_semantics<arbitrary>], iteration_bounds = array<i64: 2, 2>, scalar_prefetch = 0 : i64, scratch_operands = 1 : i64, tpu.core_type = #tpu.core_type<tc>, window_params = [{transform_indices = @transform_0, window_bounds = array<i64: 1, 8, 32>}, {transform_indices = @transform_1, window_bounds = array<i64: 1, 6, 32>}, {transform_indices = @transform_2, window_bounds = array<i64: 1, 3, 4, 32, 8>}, {transform_indices = @transform_3, window_bounds = array<i64: 1, 4, 8, 32>}, {transform_indices = @transform_4, window_bounds = array<i64: 1, 32, 64>}, {transform_indices = @transform_5, window_bounds = array<i64: 1, 1, 64>}, {transform_indices = @transform_6, window_bounds = array<i64: 1, 64, 32>}, {transform_indices = @transform_7, window_bounds = array<i64: 1, 8, 32>}]} {
    %c0_i32 = arith.constant 0 : i32
    %0 = arith.cmpi eq, %arg1, %c0_i32 : i32
    %1 = arith.extui %0 : i1 to i32
    %c0_i32_0 = arith.constant 0 : i32
    %2 = arith.cmpi ne, %1, %c0_i32_0 : i32
    scf.if %2 {
      %c0_67 = arith.constant 0 : index
      %c0_68 = arith.constant 0 : index
      %c0_69 = arith.constant 0 : index
      %117 = vector.load %arg2[%c0_67, %c0_68, %c0_69] : memref<1x8x32xf32, #tpu.memory_space<vmem>>, vector<1x8x32xf32>
      %118 = vector.shape_cast %117 : vector<1x8x32xf32> to vector<8x32xf32>
      %c0_70 = arith.constant 0 : index
      %c0_71 = arith.constant 0 : index
      %119 = vector.load %arg10[%c0_70, %c0_71] : memref<8x32xf32, #tpu.memory_space<vmem>>, vector<8x32xf32>
      tpu.vector_store %arg10[%c0_70, %c0_71], %118 {strides = array<i32>} : memref<8x32xf32, #tpu.memory_space<vmem>>, vector<8x32xf32>,
    } else {
    }
    %c0 = arith.constant 0 : index
    %c0_1 = arith.constant 0 : index
    %3 = vector.load %arg10[%c0, %c0_1] : memref<8x32xf32, #tpu.memory_space<vmem>>, vector<8x32xf32>
    %c0_2 = arith.constant 0 : index
    %c0_3 = arith.constant 0 : index
    %c0_4 = arith.constant 0 : index
    %4 = vector.load %arg3[%c0_2, %c0_3, %c0_4] : memref<1x6x32xf32, #tpu.memory_space<vmem>>, vector<1x1x32xf32>
    %5 = vector.shape_cast %4 : vector<1x1x32xf32> to vector<32xf32>
    %c0_5 = arith.constant 0 : index
    %c1 = arith.constant 1 : index
    %c0_6 = arith.constant 0 : index
    %6 = vector.load %arg3[%c0_5, %c1, %c0_6] : memref<1x6x32xf32, #tpu.memory_space<vmem>>, vector<1x1x32xf32>
    %7 = vector.shape_cast %6 : vector<1x1x32xf32> to vector<32xf32>
    %cst = arith.constant dense<0.000000e+00> : vector<8xf32>
    %8 = vector.multi_reduction <add>, %3, %cst [1] : vector<8x32xf32> to vector<8xf32>
    %9 = vector.shape_cast %8 : vector<8xf32> to vector<8x1xf32>
    %cst_7 = arith.constant 3.200000e+01 : f32
    %10 = vector.broadcast %cst_7 : f32 to vector<8x1xf32>
    %11 = arith.divf %9, %10 : vector<8x1xf32>
    %12 = vector.broadcast %11 : vector<8x1xf32> to vector<8x32xf32>
    %13 = arith.subf %3, %12 : vector<8x32xf32>
    %14 = arith.mulf %13, %13 : vector<8x32xf32>
    %cst_8 = arith.constant dense<0.000000e+00> : vector<8xf32>
    %15 = vector.multi_reduction <add>, %14, %cst_8 [1] : vector<8x32xf32> to vector<8xf32>
    %16 = vector.shape_cast %15 : vector<8xf32> to vector<8x1xf32>
    %cst_9 = arith.constant 3.200000e+01 : f32
    %17 = vector.broadcast %cst_9 : f32 to vector<8x1xf32>
    %18 = arith.divf %16, %17 : vector<8x1xf32>
    %19 = vector.broadcast %11 : vector<8x1xf32> to vector<8x32xf32>
    %20 = arith.subf %3, %19 : vector<8x32xf32>
    %cst_10 = arith.constant 9.99999974E-6 : f32
    %21 = vector.broadcast %cst_10 : f32 to vector<8x1xf32>
    %22 = arith.addf %18, %21 : vector<8x1xf32>
    %23 = math.rsqrt %22 : vector<8x1xf32>
    %24 = vector.broadcast %23 : vector<8x1xf32> to vector<8x32xf32>
    %25 = arith.mulf %20, %24 : vector<8x32xf32>
    %26 = vector.shape_cast %5 : vector<32xf32> to vector<1x32xf32>
    %27 = vector.broadcast %26 : vector<1x32xf32> to vector<8x32xf32>
    %28 = arith.mulf %25, %27 : vector<8x32xf32>
    %29 = vector.shape_cast %7 : vector<32xf32> to vector<1x32xf32>
    %30 = vector.broadcast %29 : vector<1x32xf32> to vector<8x32xf32>
    %31 = arith.addf %28, %30 : vector<8x32xf32>
    %32 = vector.shape_cast %31 : vector<8x32xf32> to vector<1x8x32xf32>
    %33 = vector.shape_cast %32 : vector<1x8x32xf32> to vector<1x8x32xf32>
    %34 = vector.broadcast %33 : vector<1x8x32xf32> to vector<4x8x32xf32>
    %c0_11 = arith.constant 0 : index
    %c0_12 = arith.constant 0 : index
    %c0_13 = arith.constant 0 : index
    %c0_14 = arith.constant 0 : index
    %c0_15 = arith.constant 0 : index
    %35 = vector.load %arg4[%c0_11, %c0_12, %c0_13, %c0_14, %c0_15] : memref<1x3x4x32x8xf32, #tpu.memory_space<vmem>>, vector<1x1x4x32x8xf32>
    %36 = vector.shape_cast %35 : vector<1x1x4x32x8xf32> to vector<4x32x8xf32>
    "tpu.trace_start"() <{level = 10 : i32, message = "hnc,hcd->hnd"}> : () -> ()
    %cst_16 = arith.constant dense<0.000000e+00> : vector<4x8x8xf32>
    %37 = tpu.matmul %34, %36, %cst_16 {dimension_numbers = #tpu.dot_dimension_numbers<[2], [1], [1], [2], [0, 0, 0, 1, 1, 2], [0], [0]>} : vector<4x8x32xf32>, vector<4x32x8xf32>, vector<4x8x8xf32> -> vector<4x8x8xf32>
    "tpu.trace_stop"() : () -> ()
    %c0_17 = arith.constant 0 : index
    %c1_18 = arith.constant 1 : index
    %c0_19 = arith.constant 0 : index
    %c0_20 = arith.constant 0 : index
    %c0_21 = arith.constant 0 : index
    %38 = vector.load %arg4[%c0_17, %c1_18, %c0_19, %c0_20, %c0_21] : memref<1x3x4x32x8xf32, #tpu.memory_space<vmem>>, vector<1x1x4x32x8xf32>
    %39 = vector.shape_cast %38 : vector<1x1x4x32x8xf32> to vector<4x32x8xf32>
    "tpu.trace_start"() <{level = 10 : i32, message = "hnc,hcd->hnd"}> : () -> ()
    %cst_22 = arith.constant dense<0.000000e+00> : vector<4x8x8xf32>
    %40 = tpu.matmul %34, %39, %cst_22 {dimension_numbers = #tpu.dot_dimension_numbers<[2], [1], [1], [2], [0, 0, 0, 1, 1, 2], [0], [0]>} : vector<4x8x32xf32>, vector<4x32x8xf32>, vector<4x8x8xf32> -> vector<4x8x8xf32>
    "tpu.trace_stop"() : () -> ()
    %c0_23 = arith.constant 0 : index
    %c2 = arith.constant 2 : index
    %c0_24 = arith.constant 0 : index
    %c0_25 = arith.constant 0 : index
    %c0_26 = arith.constant 0 : index
    %41 = vector.load %arg4[%c0_23, %c2, %c0_24, %c0_25, %c0_26] : memref<1x3x4x32x8xf32, #tpu.memory_space<vmem>>, vector<1x1x4x32x8xf32>
    %42 = vector.shape_cast %41 : vector<1x1x4x32x8xf32> to vector<4x32x8xf32>
    "tpu.trace_start"() <{level = 10 : i32, message = "hnc,hcd->hnd"}> : () -> ()
    %cst_27 = arith.constant dense<0.000000e+00> : vector<4x8x8xf32>
    %43 = tpu.matmul %34, %42, %cst_27 {dimension_numbers = #tpu.dot_dimension_numbers<[2], [1], [1], [2], [0, 0, 0, 1, 1, 2], [0], [0]>} : vector<4x8x32xf32>, vector<4x32x8xf32>, vector<4x8x8xf32> -> vector<4x8x8xf32>
    "tpu.trace_stop"() : () -> ()
    "tpu.trace_start"() <{level = 10 : i32, message = "hnd,hmd->hnm"}> : () -> ()
    %cst_28 = arith.constant dense<0.000000e+00> : vector<4x8x8xf32>
    %44 = tpu.matmul %37, %40, %cst_28 {dimension_numbers = #tpu.dot_dimension_numbers<[2], [2], [1], [1], [0, 0, 0, 1, 1, 1], [0], [0]>} : vector<4x8x8xf32>, vector<4x8x8xf32>, vector<4x8x8xf32> -> vector<4x8x8xf32>
    "tpu.trace_stop"() : () -> ()
    %cst_29 = arith.constant dense<0xFF800000> : vector<4x8xf32>
    %45 = vector.multi_reduction <maximumf>, %44, %cst_29 [2] : vector<4x8x8xf32> to vector<4x8xf32>
    %46 = vector.shape_cast %45 : vector<4x8xf32> to vector<4x8x1xf32>
    %47 = vector.broadcast %46 : vector<4x8x1xf32> to vector<4x8x8xf32>
    %48 = arith.subf %44, %47 : vector<4x8x8xf32>
    %49 = math.exp %48 : vector<4x8x8xf32>
    %cst_30 = arith.constant dense<0.000000e+00> : vector<4x8xf32>
    %50 = vector.multi_reduction <add>, %49, %cst_30 [2] : vector<4x8x8xf32> to vector<4x8xf32>
    %51 = vector.shape_cast %50 : vector<4x8xf32> to vector<4x8x1xf32>
    %52 = tpu.reciprocal %51 {approx = true} : vector<4x8x1xf32> -> vector<4x8x1xf32>
    %53 = vector.broadcast %52 : vector<4x8x1xf32> to vector<4x8x8xf32>
    %54 = arith.mulf %49, %53 : vector<4x8x8xf32>
    "tpu.trace_start"() <{level = 10 : i32, message = "hnm,hmd->hnd"}> : () -> ()
    %cst_31 = arith.constant dense<0.000000e+00> : vector<4x8x8xf32>
    %55 = tpu.matmul %54, %43, %cst_31 {dimension_numbers = #tpu.dot_dimension_numbers<[2], [1], [1], [2], [0, 0, 0, 1, 1, 2], [0], [0]>} : vector<4x8x8xf32>, vector<4x8x8xf32>, vector<4x8x8xf32> -> vector<4x8x8xf32>
    "tpu.trace_stop"() : () -> ()
    %c0_32 = arith.constant 0 : index
    %c0_33 = arith.constant 0 : index
    %c0_34 = arith.constant 0 : index
    %c0_35 = arith.constant 0 : index
    %56 = vector.load %arg5[%c0_32, %c0_33, %c0_34, %c0_35] : memref<1x4x8x32xf32, #tpu.memory_space<vmem>>, vector<1x4x8x32xf32>
    %57 = vector.shape_cast %56 : vector<1x4x8x32xf32> to vector<4x8x32xf32>
    "tpu.trace_start"() <{level = 10 : i32, message = "hnd,hdc->hnc"}> : () -> ()
    %cst_36 = arith.constant dense<0.000000e+00> : vector<4x8x32xf32>
    %58 = tpu.matmul %55, %57, %cst_36 {dimension_numbers = #tpu.dot_dimension_numbers<[2], [1], [1], [2], [0, 0, 0, 1, 1, 2], [0], [0]>} : vector<4x8x8xf32>, vector<4x8x32xf32>, vector<4x8x32xf32> -> vector<4x8x32xf32>
    "tpu.trace_stop"() : () -> ()
    %cst_37 = arith.constant dense<0.000000e+00> : vector<8x32xf32>
    %59 = vector.multi_reduction <add>, %58, %cst_37 [0] : vector<4x8x32xf32> to vector<8x32xf32>
    %c0_38 = arith.constant 0 : index
    %c2_39 = arith.constant 2 : index
    %c0_40 = arith.constant 0 : index
    %60 = vector.load %arg3[%c0_38, %c2_39, %c0_40] : memref<1x6x32xf32, #tpu.memory_space<vmem>>, vector<1x1x32xf32>
    %61 = vector.shape_cast %60 : vector<1x1x32xf32> to vector<32xf32>
    %62 = vector.shape_cast %61 : vector<32xf32> to vector<1x32xf32>
    %63 = vector.broadcast %62 : vector<1x32xf32> to vector<8x32xf32>
    %64 = arith.addf %59, %63 : vector<8x32xf32>
    %65 = arith.addf %3, %64 : vector<8x32xf32>
    %c0_41 = arith.constant 0 : index
    %c3 = arith.constant 3 : index
    %c0_42 = arith.constant 0 : index
    %66 = vector.load %arg3[%c0_41, %c3, %c0_42] : memref<1x6x32xf32, #tpu.memory_space<vmem>>, vector<1x1x32xf32>
    %67 = vector.shape_cast %66 : vector<1x1x32xf32> to vector<32xf32>
    %c0_43 = arith.constant 0 : index
    %c4 = arith.constant 4 : index
    %c0_44 = arith.constant 0 : index
    %68 = vector.load %arg3[%c0_43, %c4, %c0_44] : memref<1x6x32xf32, #tpu.memory_space<vmem>>, vector<1x1x32xf32>
    %69 = vector.shape_cast %68 : vector<1x1x32xf32> to vector<32xf32>
    %cst_45 = arith.constant dense<0.000000e+00> : vector<8xf32>
    %70 = vector.multi_reduction <add>, %65, %cst_45 [1] : vector<8x32xf32> to vector<8xf32>
    %71 = vector.shape_cast %70 : vector<8xf32> to vector<8x1xf32>
    %cst_46 = arith.constant 3.200000e+01 : f32
    %72 = vector.broadcast %cst_46 : f32 to vector<8x1xf32>
    %73 = arith.divf %71, %72 : vector<8x1xf32>
    %74 = vector.broadcast %73 : vector<8x1xf32> to vector<8x32xf32>
    %75 = arith.subf %65, %74 : vector<8x32xf32>
    %76 = arith.mulf %75, %75 : vector<8x32xf32>
    %cst_47 = arith.constant dense<0.000000e+00> : vector<8xf32>
    %77 = vector.multi_reduction <add>, %76, %cst_47 [1] : vector<8x32xf32> to vector<8xf32>
    %78 = vector.shape_cast %77 : vector<8xf32> to vector<8x1xf32>
    %cst_48 = arith.constant 3.200000e+01 : f32
    %79 = vector.broadcast %cst_48 : f32 to vector<8x1xf32>
    %80 = arith.divf %78, %79 : vector<8x1xf32>
    %81 = vector.broadcast %73 : vector<8x1xf32> to vector<8x32xf32>
    %82 = arith.subf %65, %81 : vector<8x32xf32>
    %cst_49 = arith.constant 9.99999974E-6 : f32
    %83 = vector.broadcast %cst_49 : f32 to vector<8x1xf32>
    %84 = arith.addf %80, %83 : vector<8x1xf32>
    %85 = math.rsqrt %84 : vector<8x1xf32>
    %86 = vector.broadcast %85 : vector<8x1xf32> to vector<8x32xf32>
    %87 = arith.mulf %82, %86 : vector<8x32xf32>
    %88 = vector.shape_cast %67 : vector<32xf32> to vector<1x32xf32>
    %89 = vector.broadcast %88 : vector<1x32xf32> to vector<8x32xf32>
    %90 = arith.mulf %87, %89 : vector<8x32xf32>
    %91 = vector.shape_cast %69 : vector<32xf32> to vector<1x32xf32>
    %92 = vector.broadcast %91 : vector<1x32xf32> to vector<8x32xf32>
    %93 = arith.addf %90, %92 : vector<8x32xf32>
    %c0_50 = arith.constant 0 : index
    %c0_51 = arith.constant 0 : index
    %c0_52 = arith.constant 0 : index
    %94 = vector.load %arg6[%c0_50, %c0_51, %c0_52] : memref<1x32x64xf32, #tpu.memory_space<vmem>>, vector<1x32x64xf32>
    %95 = vector.shape_cast %94 : vector<1x32x64xf32> to vector<32x64xf32>
    %cst_53 = arith.constant dense<0.000000e+00> : vector<8x64xf32>
    %96 = tpu.matmul %93, %95, %cst_53 {dimension_numbers = #tpu.dot_dimension_numbers<[1], [0], [0], [1], [0, 0, 1, 1], [], []>} : vector<8x32xf32>, vector<32x64xf32>, vector<8x64xf32> -> vector<8x64xf32>
    %c0_54 = arith.constant 0 : index
    %c0_55 = arith.constant 0 : index
    %c0_56 = arith.constant 0 : index
    %97 = vector.load %arg7[%c0_54, %c0_55, %c0_56] : memref<1x1x64xf32, #tpu.memory_space<vmem>>, vector<1x1x64xf32>
    %98 = vector.shape_cast %97 : vector<1x1x64xf32> to vector<64xf32>
    %99 = vector.shape_cast %98 : vector<64xf32> to vector<1x64xf32>
    %100 = vector.broadcast %99 : vector<1x64xf32> to vector<8x64xf32>
    %101 = arith.addf %96, %100 : vector<8x64xf32>
    %cst_57 = arith.constant 0.000000e+00 : f32
    %102 = vector.broadcast %cst_57 : f32 to vector<8x64xf32>
    %103 = arith.maximumf %101, %102 : vector<8x64xf32>
    %c0_58 = arith.constant 0 : index
    %c0_59 = arith.constant 0 : index
    %c0_60 = arith.constant 0 : index
    %104 = vector.load %arg8[%c0_58, %c0_59, %c0_60] : memref<1x64x32xf32, #tpu.memory_space<vmem>>, vector<1x64x32xf32>
    %105 = vector.shape_cast %104 : vector<1x64x32xf32> to vector<64x32xf32>
    %cst_61 = arith.constant dense<0.000000e+00> : vector<8x32xf32>
    %106 = tpu.matmul %103, %105, %cst_61 {dimension_numbers = #tpu.dot_dimension_numbers<[1], [0], [0], [1], [0, 0, 1, 1], [], []>} : vector<8x64xf32>, vector<64x32xf32>, vector<8x32xf32> -> vector<8x32xf32>
    %c0_62 = arith.constant 0 : index
    %c5 = arith.constant 5 : index
    %c0_63 = arith.constant 0 : index
    %107 = vector.load %arg3[%c0_62, %c5, %c0_63] : memref<1x6x32xf32, #tpu.memory_space<vmem>>, vector<1x1x32xf32>
    %108 = vector.shape_cast %107 : vector<1x1x32xf32> to vector<32xf32>
    %109 = vector.shape_cast %108 : vector<32xf32> to vector<1x32xf32>
    %110 = vector.broadcast %109 : vector<1x32xf32> to vector<8x32xf32>
    %111 = arith.addf %106, %110 : vector<8x32xf32>
    %112 = arith.addf %65, %111 : vector<8x32xf32>
    %c0_64 = arith.constant 0 : index
    %c0_65 = arith.constant 0 : index
    %113 = vector.load %arg10[%c0_64, %c0_65] : memref<8x32xf32, #tpu.memory_space<vmem>>, vector<8x32xf32>
    tpu.vector_store %arg10[%c0_64, %c0_65], %112 {strides = array<i32>} : memref<8x32xf32, #tpu.memory_space<vmem>>, vector<8x32xf32>,
    %c1_i32 = arith.constant 1 : i32
    %114 = arith.cmpi eq, %arg1, %c1_i32 : i32
    %115 = arith.extui %114 : i1 to i32
    %c0_i32_66 = arith.constant 0 : i32
    %116 = arith.cmpi ne, %115, %c0_i32_66 : i32
    scf.if %116 {
      %c0_67 = arith.constant 0 : index
      %c0_68 = arith.constant 0 : index
      %c0_69 = arith.constant 0 : index
      %117 = vector.load %arg9[%c0_67, %c0_68, %c0_69] : memref<1x8x32xf32, #tpu.memory_space<vmem>>, vector<1x8x32xf32>
      %118 = vector.shape_cast %117 : vector<1x8x32xf32> to vector<8x32xf32>
      %119 = vector.shape_cast %112 : vector<8x32xf32> to vector<1x8x32xf32>
      tpu.vector_store %arg9[%c0_67, %c0_68, %c0_69], %119 {strides = array<i32>} : memref<1x8x32xf32, #tpu.memory_space<vmem>>, vector<1x8x32xf32>,
    } else {
    }
    return
  }
  func.func @transform_0(%arg0: i32, %arg1: i32) -> (i32, i32, i32) {
    %c0_i32 = arith.constant 0 : i32
    %c0_i32_0 = arith.constant 0 : i32
    %c0_i32_1 = arith.constant 0 : i32
    return %arg0, %c0_i32, %c0_i32_0 : i32, i32, i32
  }
  func.func @transform_1(%arg0: i32, %arg1: i32) -> (i32, i32, i32) {
    %c0_i32 = arith.constant 0 : i32
    %c0_i32_0 = arith.constant 0 : i32
    %c0_i32_1 = arith.constant 0 : i32
    return %arg1, %c0_i32, %c0_i32_0 : i32, i32, i32
  }
  func.func @transform_2(%arg0: i32, %arg1: i32) -> (i32, i32, i32, i32, i32) {
    %c0_i32 = arith.constant 0 : i32
    %c0_i32_0 = arith.constant 0 : i32
    %c0_i32_1 = arith.constant 0 : i32
    %c0_i32_2 = arith.constant 0 : i32
    %c0_i32_3 = arith.constant 0 : i32
    return %arg1, %c0_i32, %c0_i32_0, %c0_i32_1, %c0_i32_2 : i32, i32, i32, i32, i32
  }
  func.func @transform_3(%arg0: i32, %arg1: i32) -> (i32, i32, i32, i32) {
    %c0_i32 = arith.constant 0 : i32
    %c0_i32_0 = arith.constant 0 : i32
    %c0_i32_1 = arith.constant 0 : i32
    %c0_i32_2 = arith.constant 0 : i32
    return %arg1, %c0_i32, %c0_i32_0, %c0_i32_1 : i32, i32, i32, i32
  }
  func.func @transform_4(%arg0: i32, %arg1: i32) -> (i32, i32, i32) {
    %c0_i32 = arith.constant 0 : i32
    %c0_i32_0 = arith.constant 0 : i32
    %c0_i32_1 = arith.constant 0 : i32
    return %arg1, %c0_i32, %c0_i32_0 : i32, i32, i32
  }
  func.func @transform_5(%arg0: i32, %arg1: i32) -> (i32, i32, i32) {
    %c0_i32 = arith.constant 0 : i32
    %c0_i32_0 = arith.constant 0 : i32
    %c0_i32_1 = arith.constant 0 : i32
    return %arg1, %c0_i32, %c0_i32_0 : i32, i32, i32
  }
  func.func @transform_6(%arg0: i32, %arg1: i32) -> (i32, i32, i32) {
    %c0_i32 = arith.constant 0 : i32
    %c0_i32_0 = arith.constant 0 : i32
    %c0_i32_1 = arith.constant 0 : i32
    return %arg1, %c0_i32, %c0_i32_0 : i32, i32, i32
  }
  func.func @transform_7(%arg0: i32, %arg1: i32) -> (i32, i32, i32) {
    %c0_i32 = arith.constant 0 : i32
    %c0_i32_0 = arith.constant 0 : i32
    %c0_i32_1 = arith.constant 0 : i32
    return %arg0, %c0_i32, %c0_i32_0 : i32, i32, i32
  }
}

</mosaic_0001>

<bundles_post_ra>
// kernel: tpu_custom_call.1
= control target key start
LH: loop header
LB: loop body
LE: loop exit
PB: predicated region body
PF: predicated region fallthrough
CT: control target
= control target key end

     0   :  { %s3785_s0 = inlined_call_operand.vmem [shape: f32[2,8,32], index: 0, kind: input, shape index: {}]   ;;  %s3786_s1 = inlined_call_operand.vmem [shape: f32[2,6,32], index: 1, kind: input, shape index: {}]   ;;  %s3787_s2 = inlined_call_operand.vmem [shape: f32[2,3,4,32,8], index: 2, kind: input, shape index: {}]   ;;  %s3788_s3 = inlined_call_operand.vmem [shape: f32[2,4,8,32], index: 3, kind: input, shape index: {}]   ;;  %s3789_s4 = inlined_call_operand.vmem [shape: f32[2,32,64], index: 4, kind: input, shape index: {}]   ;;  %s3790_s5 = inlined_call_operand.vmem [shape: f32[2,1,64], index: 5, kind: input, shape index: {}]   ;;  %s3791_s6 = inlined_call_operand.vmem [shape: f32[2,64,32], index: 6, kind: input, shape index: {}]   ;;  %s3792_s7 = inlined_call_operand.hbm [shape: f32[2,8,32], index: 7, kind: output, shape index: {}]  }
   0x1   :  { %3802 = sst [smem:[#allocation15_spill]] %s3785_s0 }
   0x2   :  { %3803 = sst [smem:[#allocation16_spill]] %s3786_s1 }
   0x3   :  { %12 = vsyncpa [#allocation4], 0 }
   0x4   :  { %14 = vsyncpa [#allocation4 + $0x1], 0  ;;  %s3371_s24 = smov 0   ;;  %s3373_s25 = smov 0  }
   0x5   :  { %s3375_s26 = smov 0   ;;  %s3377_s27 = smov 0  }
   0x6   :  { %s3379_s28 = smov 0   ;;  %s3381_s29 = smov 0  }
   0x7   :  { %s3383_s30 = smov 0   ;;  %s3385_s8 = smov 0  }
   0x8 LB: > { %3804 = sst [smem:[#allocation6_spill]] %s3297_s24  ;;  %s2633_s9 = sadd.s32 4294967295, %s3325_s8   ;;  %s3325_s8 = sphi %s3385_s8, %s20_s8   ;;  %s3321_s30 = sphi %s3383_s30, %s3826_s30   ;;  %s3317_s29 = sphi %s3381_s29, %s3825_s29   ;;  %s3313_s28 = sphi %s3379_s28, %s3824_s28   ;;  %s3309_s27 = sphi %s3377_s27, %s3823_s27   ;;  %s3305_s26 = sphi %s3375_s26, %s3822_s26   ;;  %s3301_s25 = sphi %s3373_s25, %s3828_s25   ;;  %s3297_s24 = sphi %s3371_s24, %s3827_s24  }
   0x9   : > { %3805 = sst [smem:[#allocation7_spill]] %s3305_s26  ;;  %s2634_s10 = sadd.s32 4294967294, %s3325_s8  }
   0xa   : > { %3806 = sst [smem:[#allocation8_spill]] %s3317_s29  ;;  %s29_s11 = sadd.s32 1, %s3317_s29 }
   0xb   : > { %3807 = sst [smem:[#allocation9_spill]] %s3321_s30  ;;  %p30_p0 = scmp.ge.s32.totalorder %s29_s11, 2 }
   0xc   : > { %3808 = sst [smem:[#allocation10_spill]] %s3325_s8  ;;  %s32_s12 = sadd.s32 1, %s3321_s30 }
   0xd   : > { %p231_p1 = scmp.ne.s32.totalorder %s3305_s26, %s3301_s25  ;;  %p232_p2 = scmp.eq.s32.totalorder %s2633_s9, 3 }
   0xe   : > { %s3830_s11 = smov (%p30_p0, %s29_s11), 0  ;;  %s3832_s12 = smov (!%p30_p0, %s32_s12), %s3321_s30 }
   0xf   : > { %3809 = sst [smem:[#allocation11_spill]] %s3830_s11  ;;  %p3420_p3 = por %p232_p2, %p231_p1 }
  0x10   : > { %p237_p4 = scmp.ne.s32.totalorder %s3301_s25, %s3297_s24  ;;  %p34_p5 = scmp.ge.s32.totalorder %s3832_s12, 2 }
  0x11   : > { %p238_p6 = scmp.eq.s32.totalorder %s2634_s10, 3  ;;  %p2637_p7 = scmp.ge.s32.totalorder %s3325_s8, 1 }
  0x12   : > { %p308_p8 = scmp.lt.s32.totalorder %s3325_s8, 5  ;;  %s3834_s12 = smov (%p34_p5, %s3832_s12), 0 }
  0x13   : > { %3811 = sst [smem:[#allocation12_spill]] %s3834_s12  ;;  %p3430_p9 = por %p238_p6, %p237_p4 }
  0x14   : > { %p309_p10 = pnand %p2637_p7, %p308_p8  ;;  %s218_s15 = ssub.s32 %s3321_s30, %s3834_s12 }
  0x15   : > { %s3812_s14 = scalar_select %p3430_p9, 1, 0 }
  0x16   : > { %s221_s16 = sadd.s32 1, %s3305_s26  ;;  %p219_p11 = scmp.eq.s32.totalorder %s218_s15, 0 }
  0x17   : > { %3813 = sst [smem:[#allocation13_spill]] %s3812_s14  ;;  %312 = sbr.rel (%p309_p10) target bundleno = 2326 (0x916), region = 48 }
  0x18   : > { %s3438_s17 = scalar_select %p219_p11, %s3305_s26, %s221_s16  }
  0x19   : > { %s3794_s18 = sand.u32 (!%p309_p10), 1, %s3301_s25   ;;  %p366_p12 = scmp.lt.s32.totalorder (!%p309_p10), %s3313_s28, 1 }
  0x1a   : > { %3814 = sst [smem:[#allocation14_spill]] %s3438_s17  ;;  %s3444_s19 = sshll.u32 (!%p309_p10), %s3794_s18, 3 }
  0x1b   : > { %p370_p13 = scmp.lt.s32.totalorder (!%p309_p10), %s3309_s27, 1  ;;  %s3815_s0 = sld [smem:[#allocation15_spill]] (!%p309_p10) }
  0x1c   : > { %s3816_s1 = sld [smem:[#allocation16_spill]] (!%p309_p10)  ;;  %s365_s17 = scalar_lea.vmem (!%p309_p10), [#allocation3], %s3444_s19 }
  0x1d   : > { %p2648_p0 = scmp.ne.s32.totalorder (!%p309_p10), %s3309_s27, 0 }
  0x1e   : > { %s367_s20 = scalar_select %p366_p12, %s3313_s28, 1 }
  0x1f   : > { %s3449_s21 = scalar_select %p370_p13, %s3309_s27, 1 }
  0x20   : > { %s2639_s22 = sshll.u32 %s367_s20, 3  ;;  %400 = sbr.rel (%p2648_p0) target bundleno = 39 (0x27), region = 52  ;;  %vm402_vm0 = vcmask (!%p2648_p0), 261120  }
  0x21   : > { %s369_s10 = scalar_lea.vmem %s3815_s0, %s2639_s22  ;;  %s2640_s15 = sshll.u32 %s3449_s21, 3 }
  0x22   : > { %s3458_s18 = scalar_lea.vmem %s3816_s1, %s2640_s15  ;;  %s3136_s11 = smul.u32 384, %s3449_s21  ;;  %v401_v0 = vld [vmem:[%s369_s10] sm:$0xff] (!%p2648_p0) }
  0x23   : > { %s2723_s30 = sshll.u32 %s3449_s21, 5  ;;  %s391_s26 = scalar_lea.vmem %s3790_s5, %s3449_s21  ;;  %403 = vst.msk [vmem:[#allocation2] sm:$0xff] (!%p2648_p0), %vm402_vm0, %v401_v0 }
  0x24   : > { %s3469_s20 = scalar_lea.vmem %s3787_s2, %s3136_s11  ;;  %s3474_s22 = scalar_lea.vmem %s3788_s3, %s2723_s30 }
  0x25   : > { %s3479_s15 = scalar_lea.vmem %s3789_s4, %s2723_s30  ;;  %s2725_s16 = sshll.u32 %s3449_s21, 6 }
  0x26   : > { %s3485_s29 = scalar_lea.vmem %s3791_s6, %s2725_s16 }
  0x27 PF: > { %vm407_vm1 = vcmask 261120   ;;  %v432_v8 = vld [vmem:[%s3469_s20] sm:$0xff]  ;;  %v433_v9 = vld [vmem:[%s3469_s20 + $0x8] sm:$0xff]  ;;  %v3327_v13 = vmov 0.0|0.0   ;;  %v434_v15 = vld [vmem:[%s3469_s20 + $0x10] sm:$0xff]  ;;  %vm3328_vm2 = vmmov 0  }
  0x28   : > { %v436_v10 = vld [vmem:[%s3469_s20 + $0x20] sm:$0xff]  ;;  %v3047_v11 = vpack.c.bf16 %v433_v9, %v432_v8  ;;  %v437_v12 = vld [vmem:[%s3469_s20 + $0x28] sm:$0xff]  ;;  %3046 = vmatprep.subr.bf16.mxu0 %v3327_v13  ;;  %3052 = vmatprep.subr.bf16.mxu1 %v3327_v13  ;;  %v435_v16 = vld [vmem:[%s3469_s20 + $0x18] sm:$0xff]  ;;  %v3329_v21 = vmov 0.0   ;;  %vm1325_vm3 = vcmask 64512   ;;  %vm2399_vm4 = vcmask 523264  }
  0x29   : > { %v3053_v14 = vpack.c.bf16 %v437_v12, %v436_v10  ;;  %v438_v17 = vld [vmem:[%s3469_s20 + $0x30] sm:$0xff]  ;;  %v3050_v18 = vpack.c.bf16 %v435_v16, %v434_v15  ;;  %v439_v19 = vld [vmem:[%s3469_s20 + $0x38] sm:$0xff]  ;;  %2832 = vmatprep.mubr.msk.f32.mxu0 %vm3328_vm2, %v3329_v21  ;;  %2843 = vmatprep.mubr.msk.f32.mxu1 %vm3328_vm2, %v3329_v21  ;;  %v2649_v26 = vld [vmem:[%s3458_s18] ss:$0 sm:$0xff]  ;;  %p2718_p1 = scmp.ne.s32.totalorder %s3309_s27, 1 }
  0x2a   : > { %v3489_v1 = vld [vmem:[#allocation2] sm:$0xff]  ;;  %3048 = vmatpush3.bf16.msra.mxu0 %v3047_v11  ;;  %v3056_v20 = vpack.c.bf16 %v439_v19, %v438_v17  ;;  %v441_v29 = vld [vmem:[%s3469_s20 + $0x48] sm:$0xff]  ;;  %v442_v36 = vld [vmem:[%s3469_s20 + $0x50] sm:$0xff] }
  0x2b   : > { %v408_v2 = vsel %vm407_vm1, %v3489_v1, 0.0  ;;  %3054 = vmatpush3.bf16.msra.mxu1 %v3053_v14  ;;  %3049 = vmatprep.subr.bf16.mxu0 %v3327_v13  ;;  %v440_v27 = vld [vmem:[%s3469_s20 + $0x40] sm:$0xff]  ;;  %v445_v31 = vld [vmem:[%s3469_s20 + $0x68] sm:$0xff]  ;;  %v443_v38 = vld [vmem:[%s3469_s20 + $0x58] sm:$0xff] }
  0x2c   : > { %409 = vadd.xlane.f32.xlu0 %v408_v2  ;;  %3055 = vmatprep.subr.bf16.mxu1 %v3327_v13  ;;  %v444_v30 = vld [vmem:[%s3469_s20 + $0x60] sm:$0xff]  ;;  %v3059_v34 = vpack.c.bf16 %v441_v29, %v440_v27  ;;  %v446_v39 = vld [vmem:[%s3469_s20 + $0x70] sm:$0xff]  ;;  %v447_v40 = vld [vmem:[%s3469_s20 + $0x78] sm:$0xff]  ;;  %v3062_v41 = vpack.c.bf16 %v443_v38, %v442_v36 }
  0x2d   : > { %v2650_v32 = vld [vmem:[%s3458_s18 + $0x1] ss:$0 sm:$0xff]  ;;  %v3065_v35 = vpack.c.bf16 %v445_v31, %v444_v30  ;;  %v3068_v42 = vpack.c.bf16 %v447_v40, %v446_v39  ;;  %v2656_v44 = vld [vmem:[%s3469_s20 + $0x88] sm:$0xff]  ;;  %v2657_v49 = vld [vmem:[%s3469_s20 + $0x90] sm:$0xff] }
  0x2e   : > { %3051 = vmatpush3.bf16.msra.mxu0 %v3050_v18  ;;  %v2655_v43 = vld [vmem:[%s3469_s20 + $0x80] sm:$0xff]  ;;  %v2660_v46 = vld [vmem:[%s3469_s20 + $0xa8] sm:$0xff]  ;;  %v2658_v50 = vld [vmem:[%s3469_s20 + $0x98] sm:$0xff] }
  0x2f   : > { %3057 = vmatpush3.bf16.msra.mxu1 %v3056_v20  ;;  %3058 = vmatprep.subr.bf16.mxu0 %v3327_v13  ;;  %v2659_v45 = vld [vmem:[%s3469_s20 + $0xa0] sm:$0xff]  ;;  %v3071_v47 = vpack.c.bf16 %v2656_v44, %v2655_v43  ;;  %v2661_v51 = vld [vmem:[%s3469_s20 + $0xb0] sm:$0xff]  ;;  %v2662_v52 = vld [vmem:[%s3469_s20 + $0xb8] sm:$0xff]  ;;  %v3074_v53 = vpack.c.bf16 %v2658_v50, %v2657_v49 }
  0x30   : > { %3064 = vmatprep.subr.bf16.mxu1 %v3327_v13  ;;  %v3077_v48 = vpack.c.bf16 %v2660_v46, %v2659_v45  ;;  %v3080_v54 = vpack.c.bf16 %v2662_v52, %v2661_v51  ;;  %v2663_v55 = vld [vmem:[%s3469_s20 + $0xc0] sm:$0xff]  ;;  %v2664_v56 = vld [vmem:[%s3469_s20 + $0xc8] sm:$0xff]  ;;  %v2665_v61 = vld [vmem:[%s3469_s20 + $0xd0] sm:$0xff] }
  0x31   : > { %v2667_v57 = vld [vmem:[%s3469_s20 + $0xe0] sm:$0xff]  ;;  %v2668_v58 = vld [vmem:[%s3469_s20 + $0xe8] sm:$0xff]  ;;  %v3083_v59 = vpack.c.bf16 %v2664_v56, %v2663_v55  ;;  %v2666_v62 = vld [vmem:[%s3469_s20 + $0xd8] sm:$0xff] }
  0x32   : > { %v3089_v60 = vpack.c.bf16 %v2668_v58, %v2667_v57  ;;  %v2669_v63 = vld [vmem:[%s3469_s20 + $0xf0] sm:$0xff]  ;;  %v2670_v0 = vld [vmem:[%s3469_s20 + $0xf8] sm:$0xff]  ;;  %v3086_v2 = vpack.c.bf16 %v2666_v62, %v2665_v61  ;;  %v2683_v17 = vld [vmem:[%s3469_s20 + $0x140] sm:$0xff] }
  0x33   : > { %v2677_v10 = vld [vmem:[%s3469_s20 + $0x110] sm:$0xff]  ;;  %v2678_v11 = vld [vmem:[%s3469_s20 + $0x118] sm:$0xff]  ;;  %v2684_v18 = vld [vmem:[%s3469_s20 + $0x148] sm:$0xff] }
  0x34   : > { %v2681_v12 = vld [vmem:[%s3469_s20 + $0x130] sm:$0xff]  ;;  %v2682_v14 = vld [vmem:[%s3469_s20 + $0x138] sm:$0xff]  ;;  %v3098_v15 = vpack.c.bf16 %v2678_v11, %v2677_v10  ;;  %v2687_v19 = vld [vmem:[%s3469_s20 + $0x160] sm:$0xff] }
  0x35   : > { %v3104_v16 = vpack.c.bf16 %v2682_v14, %v2681_v12  ;;  %v2688_v20 = vld [vmem:[%s3469_s20 + $0x168] sm:$0xff]  ;;  %v2690_v27 = vld [vmem:[%s3469_s20 + $0x178] sm:$0xff] }
  0xb9   : > { %v410_v3 = vpop.xlane.xlu0 %409 }
  0xba   : > { %v412_v4 = vmul.f32 0.03125, %v410_v3  ;;  %v3092_v3 = vpack.c.bf16 %v2670_v0, %v2669_v63 }
  0xbc   : > { %v413_v5 = vsub.f32 %v3489_v1, %v412_v4  ;;  %v2675_v4 = vld [vmem:[%s3469_s20 + $0x100] sm:$0xff] }
  0xbe   : > { %v414_v6 = vmul.f32 %v413_v5, %v413_v5 }
  0xc0   : > { %v415_v7 = vsel %vm407_vm1, %v414_v6, 0.0  ;;  %v2679_v6 = vld [vmem:[%s3469_s20 + $0x120] sm:$0xff] }
  0xc1   : > { %416 = vadd.xlane.f32.xlu0 %v415_v7  ;;  %v2680_v7 = vld [vmem:[%s3469_s20 + $0x128] sm:$0xff] }
  0xc2   : > { %v3101_v9 = vpack.c.bf16 %v2680_v7, %v2679_v6 }
 0x14e   : > { %v417_v22 = vpop.xlane.xlu0 %416 }
 0x14f   : > { %v418_v23 = vmul.f32 0.03125, %v417_v22  ;;  %v3107_v22 = vpack.c.bf16 %v2684_v18, %v2683_v17 }
 0x151   : > { %v419_v24 = vadd.f32 1e-05, %v418_v23  ;;  %v3113_v23 = vpack.c.bf16 %v2688_v20, %v2687_v19 }
 0x153   : > { %3211 = vrsqrt.f32 %v419_v24  ;;  %v2685_v24 = vld [vmem:[%s3469_s20 + $0x150] sm:$0xff] }
 0x15d   : > { %v3212_v25 = vpop.eup %3211 }
 0x15e   : > { %v421_v28 = vmul.f32 %v3212_v25, %v413_v5  ;;  %v2676_v5 = vld [vmem:[%s3469_s20 + $0x108] sm:$0xff]  ;;  %v2686_v25 = vld [vmem:[%s3469_s20 + $0x158] sm:$0xff] }
 0x15f   : > { %v3095_v8 = vpack.c.bf16 %v2676_v5, %v2675_v4 }
 0x160   : > { %v426_v33 = vmul.f32 %v2649_v26, %v421_v28  ;;  %v2689_v26 = vld [vmem:[%s3469_s20 + $0x170] sm:$0xff]  ;;  %v3110_v28 = vpack.c.bf16 %v2686_v25, %v2685_v24 }
 0x161   : > { %v3116_v29 = vpack.c.bf16 %v2690_v27, %v2689_v26 }
 0x162   : > { %v3520_v37 = vadd.f32 %v2650_v32, %v426_v33 }
 0x164   : > { %2833 = vmatmul.mubr.msk.f32.vlgmr.msra.gmra.mrb[0].mxu0 %vm407_vm1, %v3520_v37  ;;  %2844 = vmatmul.mubr.msk.f32.vlgmr.msra.gmra.mrb[0].mxu1 %vm407_vm1, %v3520_v37 }
 0x165   : > { %3060 = vmatpush3.bf16.msra.mxu0 %v3059_v34  ;;  %3066 = vmatpush3.bf16.msra.mxu1 %v3065_v35 }
 0x166   : > { %3061 = vmatprep.subr.bf16.mxu0 %v3327_v13  ;;  %3067 = vmatprep.subr.bf16.mxu1 %v3327_v13 }
 0x167   : > { %2854 = vmatprep.mubr.msk.f32.mxu0 %vm3328_vm2, %v3329_v21  ;;  %2865 = vmatprep.mubr.msk.f32.mxu1 %vm3328_vm2, %v3329_v21 }
 0x169   : > { %3063 = vmatpush3.bf16.msra.mxu0 %v3062_v41  ;;  %3069 = vmatpush3.bf16.msra.mxu1 %v3068_v42 }
 0x16a   : > { %3070 = vmatprep.subr.bf16.mxu0 %v3327_v13  ;;  %3076 = vmatprep.subr.bf16.mxu1 %v3327_v13 }
 0x16c   : > { %2855 = vmatmul.mubr.msk.f32.vlgmr.msra.gmra.mrb[2].mxu0 %vm407_vm1, %v3520_v37  ;;  %2866 = vmatmul.mubr.msk.f32.vlgmr.msra.gmra.mrb[2].mxu1 %vm407_vm1, %v3520_v37 }
 0x16d   : > { %3072 = vmatpush3.bf16.msra.mxu0 %v3071_v47  ;;  %3078 = vmatpush3.bf16.msra.mxu1 %v3077_v48 }
 0x16e   : > { %3073 = vmatprep.subr.bf16.mxu0 %v3327_v13  ;;  %3079 = vmatprep.subr.bf16.mxu1 %v3327_v13 }
 0x16f   : > { %2876 = vmatprep.mubr.msk.f32.mxu0 %vm3328_vm2, %v3329_v21  ;;  %2887 = vmatprep.mubr.msk.f32.mxu1 %vm3328_vm2, %v3329_v21 }
 0x171   : > { %3075 = vmatpush3.bf16.msra.mxu0 %v3074_v53  ;;  %3081 = vmatpush3.bf16.msra.mxu1 %v3080_v54 }
 0x172   : > { %3082 = vmatprep.subr.bf16.mxu0 %v3327_v13  ;;  %3088 = vmatprep.subr.bf16.mxu1 %v3327_v13 }
 0x174   : > { %2877 = vmatmul.mubr.msk.f32.vlgmr.msra.gmra.mrb[4].mxu0 %vm407_vm1, %v3520_v37  ;;  %2888 = vmatmul.mubr.msk.f32.vlgmr.msra.gmra.mrb[4].mxu1 %vm407_vm1, %v3520_v37 }
 0x175   : > { %3084 = vmatpush3.bf16.msra.mxu0 %v3083_v59  ;;  %3090 = vmatpush3.bf16.msra.mxu1 %v3089_v60 }
 0x176   : > { %3085 = vmatprep.subr.bf16.mxu0 %v3327_v13  ;;  %3091 = vmatprep.subr.bf16.mxu1 %v3327_v13 }
 0x177   : > { %2898 = vmatprep.mubr.msk.f32.mxu0 %vm3328_vm2, %v3329_v21  ;;  %2909 = vmatprep.mubr.msk.f32.mxu1 %vm3328_vm2, %v3329_v21 }
 0x179   : > { %3087 = vmatpush3.bf16.msra.mxu0 %v3086_v2  ;;  %3093 = vmatpush3.bf16.msra.mxu1 %v3092_v3 }
 0x17a   : > { %3094 = vmatprep.subr.bf16.mxu0 %v3327_v13  ;;  %3100 = vmatprep.subr.bf16.mxu1 %v3327_v13 }
 0x17c   : > { %2899 = vmatmul.mubr.msk.f32.vlgmr.msra.gmra.mrb[6].mxu0 %vm407_vm1, %v3520_v37  ;;  %2910 = vmatmul.mubr.msk.f32.vlgmr.msra.gmra.mrb[6].mxu1 %vm407_vm1, %v3520_v37 }
 0x17d   : > { %3096 = vmatpush3.bf16.msra.mxu0 %v3095_v8  ;;  %3102 = vmatpush3.bf16.msra.mxu1 %v3101_v9 }
 0x17e   : > { %3097 = vmatprep.subr.bf16.mxu0 %v3327_v13  ;;  %3103 = vmatprep.subr.bf16.mxu1 %v3327_v13 }
 0x17f   : > { %2920 = vmatprep.mubr.msk.f32.mxu0 %vm3328_vm2, %v3329_v21  ;;  %2931 = vmatprep.mubr.msk.f32.mxu1 %vm3328_vm2, %v3329_v21 }
 0x181   : > { %3099 = vmatpush3.bf16.msra.mxu0 %v3098_v15  ;;  %3105 = vmatpush3.bf16.msra.mxu1 %v3104_v16 }
 0x182   : > { %3106 = vmatprep.subr.bf16.mxu0 %v3327_v13  ;;  %3112 = vmatprep.subr.bf16.mxu1 %v3327_v13 }
 0x184   : > { %2921 = vmatmul.mubr.msk.f32.vlgmr.msra.gmra.mrb[8].mxu0 %vm407_vm1, %v3520_v37  ;;  %2932 = vmatmul.mubr.msk.f32.vlgmr.msra.gmra.mrb[8].mxu1 %vm407_vm1, %v3520_v37 }
 0x185   : > { %3108 = vmatpush3.bf16.msra.mxu0 %v3107_v22  ;;  %3114 = vmatpush3.bf16.msra.mxu1 %v3113_v23 }
 0x186   : > { %3109 = vmatprep.subr.bf16.mxu0 %v3327_v13  ;;  %3115 = vmatprep.subr.bf16.mxu1 %v3327_v13 }
 0x187   : > { %2942 = vmatprep.mubr.msk.f32.mxu0 %vm3328_vm2, %v3329_v21  ;;  %2953 = vmatprep.mubr.msk.f32.mxu1 %vm3328_vm2, %v3329_v21 }
 0x189   : > { %3111 = vmatpush3.bf16.msra.mxu0 %v3110_v28  ;;  %3117 = vmatpush3.bf16.msra.mxu1 %v3116_v29 }
 0x18a   : > { %2956 = vmatprep.subr.mxu0 %v3329_v21  ;;  %2971 = vmatprep.subr.mxu1 %v3329_v21 }
 0x18c   : > { %2943 = vmatmul.mubr.msk.f32.vlgmr.msra.gmra.mrb[10].mxu0 %vm407_vm1, %v3520_v37  ;;  %2954 = vmatmul.mubr.msk.f32.vlgmr.msra.gmra.mrb[10].mxu1 %vm407_vm1, %v3520_v37 }
 0x18d   : > { %2958 = vmatprep.mubr.msk.f32.mxu0 %vm3328_vm2, %v3329_v21  ;;  %2973 = vmatprep.mubr.msk.f32.mxu1 %vm3328_vm2, %v3329_v21 }
 0x237   : > { %v517_v30 = vpop.f32.mrb[0].mxu0  ;;  %v587_v31 = vpop.f32.mrb[0].mxu1 }
 0x238   : > { %v2834_v32 = vpop.f32.mrb[1].mxu0  ;;  %v2845_v33 = vpop.f32.mrb[1].mxu1 }
 0x23f   : > { %v657_v34 = vpop.f32.mrb[2].mxu0  ;;  %v727_v35 = vpop.f32.mrb[2].mxu1 }
 0x240   : > { %v2856_v36 = vpop.f32.mrb[3].mxu0  ;;  %v2867_v38 = vpop.f32.mrb[3].mxu1 }
 0x241   : > { %v1966_v38 = vld [vmem:[%s3474_s22] sm:$0xff] }
 0x247   : > { %v814_v39 = vpop.f32.mrb[4].mxu0  ;;  %v884_v40 = vpop.f32.mrb[4].mxu1 }
 0x248   : > { %v2878_v41 = vpop.f32.mrb[5].mxu0  ;;  %v2889_v42 = vpop.f32.mrb[5].mxu1  ;;  %2957 = vmatpush3.xpose.msk.msra.mxu0 %vm1325_vm3, %v814_v39  ;;  %v1967_v39 = vld [vmem:[%s3474_s22 + $0x8] sm:$0xff] }
 0x249   : > { %2961 = vmatprep.subr.mxu0 %v3329_v21 }
 0x24b   : > { %2959 = vmatmul.mubr.msk.f32.vlgmr.msra.gmra.mrb[12].mxu0 %vm1325_vm3, %v517_v30 }
 0x24c   : > { %2962 = vmatpush3.xpose.msk.msra.mxu0 %vm1325_vm3, %v884_v40  ;;  %2963 = vmatprep.mubr.msk.f32.mxu0 %vm3328_vm2, %v3329_v21  ;;  %v1968_v40 = vld [vmem:[%s3474_s22 + $0x10] sm:$0xff] }
 0x24d   : > { %2966 = vmatprep.subr.mxu0 %v3329_v21 }
 0x24f   : > { %v954_v37 = vpop.f32.mrb[6].mxu0  ;;  %v1024_v43 = vpop.f32.mrb[6].mxu1  ;;  %2964 = vmatmul.mubr.msk.f32.vlgmr.msra.gmra.mrb[14].mxu0 %vm1325_vm3, %v587_v31 }
 0x250   : > { %v2900_v44 = vpop.f32.mrb[7].mxu0  ;;  %v2911_v45 = vpop.f32.mrb[7].mxu1  ;;  %2967 = vmatpush3.xpose.msk.msra.mxu0 %vm1325_vm3, %v954_v37  ;;  %2972 = vmatpush3.xpose.msk.msra.mxu1 %vm1325_vm3, %v1024_v43  ;;  %v1969_v37 = vld [vmem:[%s3474_s22 + $0x18] sm:$0xff] }
 0x251   : > { %2968 = vmatprep.mubr.msk.f32.mxu0 %vm3328_vm2, %v3329_v21  ;;  %2976 = vmatprep.subr.mxu0 %v3329_v21 }
 0x252   : > { %2981 = vmatprep.subr.mxu1 %v3329_v21 }
 0x253   : > { %2969 = vmatmul.mubr.msk.f32.vlgmr.msra.gmra.mrb[16].mxu0 %vm1325_vm3, %v657_v34  ;;  %2974 = vmatmul.mubr.msk.f32.vlgmr.msra.gmra.mrb[12].mxu1 %vm1325_vm3, %v727_v35 }
 0x254   : > { %2978 = vmatprep.mubr.msk.f32.mxu0 %vm3328_vm2, %v3329_v21  ;;  %2983 = vmatprep.mubr.msk.f32.mxu1 %vm3328_vm2, %v3329_v21 }
 0x257   : > { %v1111_v46 = vpop.f32.mrb[8].mxu0  ;;  %v1181_v47 = vpop.f32.mrb[8].mxu1 }
 0x258   : > { %v2922_v48 = vpop.f32.mrb[9].mxu0  ;;  %v2933_v49 = vpop.f32.mrb[9].mxu1  ;;  %2977 = vmatpush3.msra.mxu0 %v1111_v46  ;;  %2982 = vmatpush3.msra.mxu1 %v1181_v47 }
 0x259   : > { %2986 = vmatprep.subr.mxu0 %v3329_v21  ;;  %2991 = vmatprep.subr.mxu1 %v3329_v21 }
 0x25f   : > { %v1251_v50 = vpop.f32.mrb[10].mxu0  ;;  %v3647_v51 = vpop.f32.mrb[10].mxu1 }
 0x260   : > { %v2944_v52 = vpop.f32.mrb[11].mxu0  ;;  %v2955_v53 = vpop.f32.mrb[11].mxu1 }
 0x31e   : > { %v1398_v54 = vpop.f32.mrb[12].mxu0 }
 0x31f   : > { %v2960_v55 = vpop.f32.mrb[13].mxu0  ;;  %v1630_v56 = vsel %vm1325_vm3, %v1398_v54, -inf }
 0x320   : > { %1631 = vmax.xlane.f32.xlu1 %v1630_v56 }
 0x322   : > { %v1474_v57 = vpop.f32.mrb[14].mxu0 }
 0x323   : > { %v2965_v58 = vpop.f32.mrb[15].mxu0  ;;  %v1633_v59 = vsel %vm1325_vm3, %v1474_v57, -inf }
 0x324   : > { %1634 = vmax.xlane.f32.xlu1 %v1633_v59 }
 0x326   : > { %v1550_v60 = vpop.f32.mrb[16].mxu0  ;;  %v1626_v61 = vpop.f32.mrb[12].mxu1 }
 0x327   : > { %v2970_v62 = vpop.f32.mrb[17].mxu0  ;;  %v2975_v63 = vpop.f32.mrb[13].mxu1  ;;  %v1639_v0 = vsel %vm1325_vm3, %v1626_v61, -inf  ;;  %v1636_v2 = vsel %vm1325_vm3, %v1550_v60, -inf }
 0x328   : > { %1640 = vmax.xlane.f32.xlu1 %v1639_v0  ;;  %1637 = vmax.xlane.f32.xlu0 %v1636_v2  ;;  %v2711_v62 = vld [vmem:[%s3458_s18 + $0x2] ss:$0 sm:$0xff] }
 0x3ad   : > { %v1632_v3 = vpop.xlane.xlu1 %1631 }
 0x3ae   : > { %v1642_v4 = vsub.f32 %v1398_v54, %v1632_v3 }
 0x3b0   : > { %v1646_v5 = vmul.f32 1.442695, %v1642_v4 }
 0x3b1   : > { %v1635_v6 = vpop.xlane.xlu1 %1634 }
 0x3b2   : > { %3213 = vpow2.f32 %v1646_v5  ;;  %v1643_v7 = vsub.f32 %v1474_v57, %v1635_v6 }
 0x3b4   : > { %v1648_v8 = vmul.f32 1.442695, %v1643_v7 }
 0x3b5   : > { %v1641_v9 = vpop.xlane.xlu1 %1640  ;;  %v1638_v10 = vpop.xlane.xlu0 %1637 }
 0x3b6   : > { %3215 = vpow2.f32 %v1648_v8  ;;  %v1645_v11 = vsub.f32 %v1626_v61, %v1641_v9  ;;  %v1644_v12 = vsub.f32 %v1550_v60, %v1638_v10  ;;  %v2301_v9 = vld [vmem:[%s3479_s15] sm:$0xff]  ;;  %v2302_v10 = vld [vmem:[%s3479_s15 + $0x8] sm:$0xff] }
 0x3b8   : > { %v1652_v14 = vmul.f32 1.442695, %v1645_v11  ;;  %v1650_v15 = vmul.f32 1.442695, %v1644_v12  ;;  %v3119_v11 = vpack.c.bf16 %v2302_v10, %v2301_v9  ;;  %v2304_v12 = vld [vmem:[%s3479_s15 + $0x18] sm:$0xff] }
 0x3ba   : > { %3217 = vpow2.f32 %v1652_v14 }
 0x3bb   : > { %3219 = vpow2.f32 %v1650_v15  ;;  %v2386_v15 = vld [vmem:[%s3485_s29] sm:$0xff] }
 0x3bc   : > { %v3214_v16 = vpop.eup %3213 }
 0x3bd   : > { %v1654_v17 = vsel %vm1325_vm3, %v3214_v16, 0.0 }
 0x3be   : > { %1655 = vadd.xlane.f32.xlu0 %v1654_v17  ;;  %v2388_v17 = vld [vmem:[%s3485_s29 + $0x10] sm:$0xff] }
 0x3c0   : > { %v3216_v18 = vpop.eup %3215 }
 0x3c1   : > { %v1657_v19 = vsel %vm1325_vm3, %v3216_v18, 0.0 }
 0x3c2   : > { %1658 = vadd.xlane.f32.xlu1 %v1657_v19  ;;  %v2389_v19 = vld [vmem:[%s3485_s29 + $0x18] sm:$0xff] }
 0x3c4   : > { %v3218_v20 = vpop.eup %3217 }
 0x3c5   : > { %v3220_v22 = vpop.eup %3219  ;;  %v1663_v23 = vsel %vm1325_vm3, %v3218_v20, 0.0 }
 0x3c6   : > { %1664 = vadd.xlane.f32.xlu1 %v1663_v23  ;;  %v1660_v24 = vsel %vm1325_vm3, %v3220_v22, 0.0  ;;  %v2391_v23 = vld [vmem:[%s3485_s29 + $0x28] sm:$0xff] }
 0x3c7   : > { %1661 = vadd.xlane.f32.xlu0 %v1660_v24 }
 0x44b   : > { %v1656_v25 = vpop.xlane.xlu0 %1655 }
 0x44c   : > { %3221 = vrcp.f32 %v1656_v25 }
 0x44f   : > { %v1659_v26 = vpop.xlane.xlu1 %1658 }
 0x450   : > { %3223 = vrcp.f32 %v1659_v26 }
 0x453   : > { %v1665_v27 = vpop.xlane.xlu1 %1664 }
 0x454   : > { %3225 = vrcp.f32 %v1665_v27  ;;  %v1662_v28 = vpop.xlane.xlu0 %1661 }
 0x455   : > { %3227 = vrcp.f32 %v1662_v28 }
 0x456   : > { %v3222_v29 = vpop.eup %3221 }
 0x457   : > { %v1670_v30 = vmul.f32 %v3222_v29, %v3214_v16  ;;  %v2387_v16 = vld [vmem:[%s3485_s29 + $0x8] sm:$0xff]  ;;  %v2712_v29 = vld [vmem:[%s3458_s18 + $0x3] ss:$0 sm:$0xff] }
 0x459   : > { %2979 = vmatmul.mubr.msk.f32.vlgmr.msra.gmra.mrb[18].mxu0 %vm1325_vm3, %v1670_v30 }
 0x45a   : > { %v3224_v31 = vpop.eup %3223  ;;  %2987 = vmatpush3.msra.mxu0 %v1251_v50  ;;  %2988 = vmatprep.mubr.msk.f32.mxu0 %vm3328_vm2, %v3329_v21 }
 0x45b   : > { %v1671_v32 = vmul.f32 %v3224_v31, %v3216_v18  ;;  %2996 = vmatprep.subr.mxu0 %v3329_v21  ;;  %v3125_v18 = vpack.c.bf16 %v2387_v16, %v2386_v15  ;;  %v2713_v31 = vld [vmem:[%s3458_s18 + $0x4] ss:$0 sm:$0xff] }
 0x45d   : > { %2984 = vmatmul.mubr.msk.f32.vlgmr.msra.gmra.mrb[14].mxu1 %vm1325_vm3, %v1671_v32 }
 0x45e   : > { %v3226_v33 = vpop.eup %3225  ;;  %2992 = vmatpush3.msra.mxu1 %v3647_v51  ;;  %2993 = vmatprep.mubr.msk.f32.mxu1 %vm3328_vm2, %v3329_v21 }
 0x45f   : > { %v3228_v34 = vpop.eup %3227  ;;  %v1673_v35 = vmul.f32 %v3226_v33, %v3218_v20  ;;  %3001 = vmatprep.subr.mxu1 %v3329_v21  ;;  %v3128_v20 = vpack.c.bf16 %v2389_v19, %v2388_v17 }
 0x460   : > { %v1672_v36 = vmul.f32 %v3228_v34, %v3220_v22  ;;  %v2390_v22 = vld [vmem:[%s3485_s29 + $0x20] sm:$0xff]  ;;  %v2392_v34 = vld [vmem:[%s3485_s29 + $0x30] sm:$0xff] }
 0x461   : > { %2994 = vmatmul.mubr.msk.f32.vlgmr.msra.gmra.mrb[16].mxu1 %vm1325_vm3, %v1673_v35  ;;  %v3131_v24 = vpack.c.bf16 %v2391_v23, %v2390_v22  ;;  %v2393_v35 = vld [vmem:[%s3485_s29 + $0x38] sm:$0xff] }
 0x462   : > { %2989 = vmatmul.mubr.msk.f32.vlgmr.msra.gmra.mrb[20].mxu0 %vm1325_vm3, %v1672_v36  ;;  %3003 = vmatprep.mubr.msk.f32.mxu1 %vm3328_vm2, %v3329_v21  ;;  %v3134_v36 = vpack.c.bf16 %v2393_v35, %v2392_v34 }
 0x463   : > { %2998 = vmatprep.mubr.msk.f32.mxu0 %vm3328_vm2, %v3329_v21  ;;  %2997 = vmatpush3.msra.mxu0 %v1966_v38 }
 0x464   : > { %3006 = vmatprep.subr.mxu0 %v3329_v21  ;;  %3002 = vmatpush3.msra.mxu1 %v1967_v39 }
 0x465   : > { %3011 = vmatprep.subr.mxu1 %v3329_v21 }
 0x52c   : > { %v1743_v41 = vpop.f32.mrb[18].mxu0 }
 0x52d   : > { %v2980_v42 = vpop.f32.mrb[19].mxu0  ;;  %2999 = vmatmul.mubr.msk.f32.vlgmr.msra.gmra.mrb[22].mxu0 %vm1325_vm3, %v1743_v41 }
 0x52e   : > { %3007 = vmatpush3.msra.mxu0 %v1968_v40  ;;  %3008 = vmatprep.mubr.msk.f32.mxu0 %vm3328_vm2, %v3329_v21  ;;  %v2716_v42 = vld [vmem:[%s3458_s18 + $0x5] ss:$0 sm:$0xff] }
 0x52f   : > { %3118 = vmatprep.subr.bf16.mxu0 %v3327_v13 }
 0x530   : > { %v1816_v43 = vpop.f32.mrb[14].mxu1 }
 0x531   : > { %v2985_v44 = vpop.f32.mrb[15].mxu1  ;;  %3004 = vmatmul.mubr.msk.f32.vlgmr.msra.gmra.mrb[18].mxu1 %vm1325_vm3, %v1816_v43 }
 0x532   : > { %3012 = vmatpush3.msra.mxu1 %v1969_v37  ;;  %3013 = vmatprep.mubr.msk.f32.mxu1 %vm3328_vm2, %v3329_v21 }
 0x533   : > { %3124 = vmatprep.subr.bf16.mxu1 %v3327_v13 }
 0x534   : > { %v1962_v45 = vpop.f32.mrb[16].mxu1 }
 0x535   : > { %v1889_v46 = vpop.f32.mrb[20].mxu0  ;;  %v2995_v47 = vpop.f32.mrb[17].mxu1  ;;  %3014 = vmatmul.mubr.msk.f32.vlgmr.msra.gmra.mrb[20].mxu1 %vm1325_vm3, %v1962_v45 }
 0x536   : > { %v2990_v48 = vpop.f32.mrb[21].mxu0  ;;  %3009 = vmatmul.mubr.msk.f32.vlgmr.msra.gmra.mrb[24].mxu0 %vm1325_vm3, %v1889_v46  ;;  %3043 = vmatprep.mubr.msk.f32.mxu1 %vm3328_vm2, %v3329_v21 }
 0x537   : > { %3024 = vmatprep.mubr.msk.f32.mxu0 %vm3328_vm2, %v3329_v21  ;;  %3120 = vmatpush3.bf16.msra.mxu0 %v3119_v11 }
 0x538   : > { %3121 = vmatprep.subr.bf16.mxu0 %v3327_v13  ;;  %3126 = vmatpush3.bf16.msra.mxu1 %v3125_v18 }
 0x539   : > { %3127 = vmatprep.subr.bf16.mxu1 %v3327_v13 }
 0x53c   : > { %3129 = vmatpush3.bf16.msra.mxu1 %v3128_v20 }
 0x53d   : > { %3130 = vmatprep.subr.bf16.mxu1 %v3327_v13 }
 0x540   : > { %3132 = vmatpush3.bf16.msra.mxu1 %v3131_v24 }
 0x541   : > { %3133 = vmatprep.subr.bf16.mxu1 %v3327_v13  ;;  %v2714_v13 = vld [vmem:[%s391_s26] ss:$0 sm:$0xff] }
 0x544   : > { %3135 = vmatpush3.bf16.msra.mxu1 %v3134_v36 }
 0x600   : > { %v2039_v49 = vpop.f32.mrb[22].mxu0 }
 0x601   : > { %v3000_v50 = vpop.f32.mrb[23].mxu0  ;;  %v2262_v52 = vsel %vm407_vm1, %v2039_v49, 0.0 }
 0x604   : > { %v2112_v51 = vpop.f32.mrb[18].mxu1 }
 0x605   : > { %v2263_v53 = vsel %vm407_vm1, %v2112_v51, 0.0  ;;  %v3005_v54 = vpop.f32.mrb[19].mxu1 }
 0x606   : > { %v2264_v55 = vadd.f32 %v2263_v53, %v2262_v52 }
 0x608   : > { %v2258_v56 = vpop.f32.mrb[20].mxu1 }
 0x609   : > { %v2185_v57 = vpop.f32.mrb[24].mxu0  ;;  %v3015_v58 = vpop.f32.mrb[21].mxu1  ;;  %v2267_v21 = vsel %vm407_vm1, %v2258_v56, 0.0 }
 0x60a   : > { %v2265_v59 = vsel %vm407_vm1, %v2185_v57, 0.0  ;;  %v3010_v60 = vpop.f32.mrb[25].mxu0 }
 0x60b   : > { %v2266_v61 = vadd.f32 %v2265_v59, %v2264_v55 }
 0x60d   : > { %v2268_v63 = vadd.f32 %v2267_v21, %v2266_v61 }
 0x60f   : > { %v2274_v0 = vadd.f32 %v2711_v62, %v2268_v63 }
 0x611   : > { %v2275_v2 = vadd.f32 %v2274_v0, %v3489_v1  ;;  %v2303_v1 = vld [vmem:[%s3479_s15 + $0x10] sm:$0xff] }
 0x612   : > { %v3122_v14 = vpack.c.bf16 %v2304_v12, %v2303_v1 }
 0x613   : > { %v2278_v3 = vsel %vm407_vm1, %v2275_v2, 0.0 }
 0x614   : > { %2279 = vadd.xlane.f32.xlu0 %v2278_v3  ;;  %3123 = vmatpush3.bf16.msra.mxu0 %v3122_v14 }
 0x6a1   : > { %v2280_v4 = vpop.xlane.xlu0 %2279 }
 0x6a2   : > { %v2281_v5 = vmul.f32 0.03125, %v2280_v4 }
 0x6a4   : > { %v2282_v6 = vsub.f32 %v2275_v2, %v2281_v5 }
 0x6a6   : > { %v2283_v7 = vmul.f32 %v2282_v6, %v2282_v6 }
 0x6a8   : > { %v2284_v8 = vsel %vm407_vm1, %v2283_v7, 0.0 }
 0x6a9   : > { %2285 = vadd.xlane.f32.xlu1 %v2284_v8 }
 0x736   : > { %v2286_v25 = vpop.xlane.xlu1 %2285 }
 0x737   : > { %v2287_v26 = vmul.f32 0.03125, %v2286_v25 }
 0x739   : > { %v2288_v27 = vadd.f32 1e-05, %v2287_v26 }
 0x73b   : > { %3229 = vrsqrt.f32 %v2288_v27 }
 0x745   : > { %v3230_v28 = vpop.eup %3229 }
 0x746   : > { %v2290_v30 = vmul.f32 %v3230_v28, %v2282_v6 }
 0x748   : > { %v2295_v32 = vmul.f32 %v2712_v29, %v2290_v30 }
 0x74a   : > { %v2300_v33 = vadd.f32 %v2713_v31, %v2295_v32 }
 0x74c   : > { %3025 = vmatmul.mubr.msk.f32.vlgmr.msra.gmra.mrb[26].mxu0 %vm407_vm1, %v2300_v33 }
 0x81f   : > { %v2381_v38 = vpop.f32.mrb[26].mxu0 }
 0x820   : > { %v2382_v39 = vadd.f32 %v2714_v13, %v2381_v38  ;;  %v3026_v40 = vpop.f32.mrb[27].mxu0 }
 0x822   : > { %v2385_v41 = vmax.f32 %v2382_v39, 0.0 }
 0x824   : > { %3044 = vmatmul.mubr.msk.f32.vlgmr.msra.gmra.mrb[22].mxu1 %vm2399_vm4, %v2385_v41 }
 0x8f6   : > { %2478 = sbr.rel (%p2718_p1) target bundleno = 2301 (0x8fd), region = 56 }
 0x8f7   : > { %v2469_v37 = vpop.f32.mrb[22].mxu1 }
 0x8f8   : > { %v2470_v43 = vadd.f32 %v2716_v42, %v2469_v37  ;;  %v3045_v44 = vpop.f32.mrb[23].mxu1 }
 0x8fa   : > { %v2473_v45 = vadd.f32 %v2470_v43, %v2275_v2 }
 0x8fc   : > { %2474 = vst.msk [vmem:[#allocation2] sm:$0xff] %vm407_vm1, %v2473_v45  ;;  %2479 = vst.msk [vmem:[%s365_s17] sm:$0xff] (!%p2718_p1), %vm407_vm1, %v2473_v45 }
 0x8fd PF: > { %s2720_s24 = sshll.u32 %s3313_s28, 7  ;;  %s2494_s11 = sshll.u32 %s365_s17, 4  ;;  %s2495_s11 = int_to_ptr.vmem [resolvable:$true] %s2494_s11 }
 0x8fe   : > { %s3734_s8 = scalar_lea.hbm %s3792_s7, %s2720_s24  ;;  %s3817_s27 = sand.u32 1, %s3301_s25  }
 0x8ff   : > { %s2481_s14 = scalar_lea.sflag [#allocation4], %s3817_s27  ;;  %s3231_s18 = scalar_lea.vmem %s2495_s11, 128 }
 0x900   : > { %p3232_p2 = scmp.ne.s32.totalorder %s2495_s11, %s3231_s18  ;;  %s3330_s21 = smov [#allocation3]  }
 0x901   : > { %s3235_s10 = sshll.u32 %s3330_s21, 4  ;;  %s3236_s10 = int_to_ptr.vmem [resolvable:$false] %s3235_s10 }
 0x902   : > { %p3233_p4 = pnand %p3232_p2, %p3420_p3  ;;  %s3237_s20 = scalar_lea.vmem %s3236_s10, 256 }
 0x903   : > { %p3238_p6 = scmp.lt.s32.totalorder %s2495_s11, %s3236_s10  ;;  %p3239_p7 = scmp.lt.s32.totalorder %s3237_s20, %s3231_s18 }
 0x904   : > { %p3234_p5 = pneg %p3233_p4 }
 0x905   : > { %p3240_p8 = por %p3239_p7, %p3238_p6 }
 0x907   : > { %p3241_p10 = pnand %p3240_p8, %p3234_p5 }
 0x909   : > { %3244 = shalt.err (!%p3241_p10)
}
 0x90a   : > { %s3245_s28 = scalar_lea.hbm %s3734_s8, 128  ;;  %s3249_s22 = scalar_lea.hbm %s3792_s7, 256 }
 0x90b   : > { %p3246_p11 = scmp.ne.s32.totalorder %s3734_s8, %s3245_s28  ;;  %p3250_p0 = scmp.lt.u32.totalorder %s3734_s8, %s3792_s7 }
 0x90c   : > { %p3251_p1 = scmp.lt.u32.totalorder %s3249_s22, %s3245_s28  ;;  %p3253_p4 = scmp.lt.u32.totalorder %s3245_s28, %s3734_s8 }
 0x90d   : > { %p3247_p12 = pnand %p3246_p11, %p3420_p3 }
 0x90e   : > { %p3252_p2 = por %p3251_p1, %p3250_p0 }
 0x90f   : > { %p3248_p13 = pneg %p3247_p12 }
 0x910   : > { %p3254_p5 = por %p3253_p4, %p3252_p2 }
 0x912   : > { %p3255_p6 = pnand %p3254_p5, %p3248_p13 }
 0x914   : > { %3258 = shalt.err (!%p3255_p6)
}
 0x915   : > { %3137 = dma.vmem_to_hbm [thread:$0]  (%p3420_p3), %s2495_s11, 128, %s3734_s8, %s2481_s14  }
 0x916 PF: > { %s3818_s15 = sld [smem:[#allocation10_spill]]  ;;  %s3819_s16 = sld [smem:[#allocation6_spill]] }
 0x91c   : > { %p3143_p7 = scmp.ge.s32.totalorder %s3818_s15, 2  ;;  %s2506_s17 = sand.u32 1, %s3819_s16  }
 0x91d   : > { %s2507_s0 = scalar_lea.sflag [#allocation4], %s2506_s17 }
 0x91e   : > { %p3140_p8 = pnand %p3143_p7, %p3430_p9 }
 0x920   : > { %3292 = dma.done.wait (!%p3140_p8), %s2507_s0, 128  }
 0x921   : > { %3294 = vsyncadd (!%p3140_p8), %s2507_s0, 4294967168  ;;  %s20_s8 = sadd.s32 1, %s3818_s15   ;;  %s3821_s1 = sld [smem:[#allocation7_spill]] }
 0x922   : > { %p17_p10 = scmp.ge.s32.totalorder %s20_s8, 6   ;;  %s3822_s26 = sld [smem:[#allocation14_spill]] }
 0x923   : > { %s3823_s27 = sld [smem:[#allocation8_spill]]  ;;  %s3824_s28 = sld [smem:[#allocation9_spill]] }
 0x924   : > { %s3825_s29 = sld [smem:[#allocation11_spill]]  ;;  %s3826_s30 = sld [smem:[#allocation12_spill]] }
 0x925   : > { %s3827_s24 = smov %s3301_s25  ;;  %19 = sbr.rel (!%p17_p10) target bundleno = 8 (0x8), region = 111 }
 0x927   : > { %s3828_s25 = smov %s3821_s1 }
 0x92c   :  { %2512 = vsyncpa [#allocation4], 1 }
 0x92d   :  { %2514 = vsyncpa [#allocation4 + $0x1], 1 }

</bundles_post_ra>
